<compile_context>
chip_gen: v5e
topology: v5e:2x2
jax: 0.10.0
libtpu: 0.0.40
codegen_flags: <defaults>
</compile_context>

<pallas_src>
import functools

import jax
import jax.numpy as jnp
from jax.experimental import pallas as pl
from jax.experimental.pallas import tpu as pltpu


_LANE = 128  # lane width: last block dim should be a multiple of this


def _round_up(n: int, m: int) -> int:
    return ((n + m - 1) // m) * m


def _sublane_pack(dtype) -> int:
    """Sublane packing of the dtype: 8 for f32, 16 for bf16, 32 for int8/fp8."""
    return max(8, 32 // jnp.dtype(dtype).itemsize)


@functools.lru_cache(maxsize=None)
def _tpu_config():
    """(vmem_capacity_bytes, num_tensorcores) with conservative fallbacks."""
    vmem = 128 << 20
    num_tc = 1
    try:
        info = pltpu.get_tpu_info()
        vmem = int(getattr(info, "vmem_capacity_bytes", vmem))
        for attr in ("num_cores", "tensorcore_count", "num_tensorcores",
                     "cores_per_chip", "num_tensor_cores"):
            v = getattr(info, attr, None)
            if isinstance(v, int) and v > 0:
                num_tc = v
                break
    except Exception:
        pass
    # v7x: 64 MiB VMEM per TensorCore, 2 TCs per chip.
    if num_tc == 1 and vmem <= (64 << 20):
        num_tc = 2
    return vmem, num_tc


def _vmem_budget(vmem_cap: int) -> int:
    """Scoped-VMEM budget with headroom for Mosaic internal scratch."""
    return max(16 << 20, min(vmem_cap - (8 << 20), int(vmem_cap * 0.8)))


@functools.lru_cache(maxsize=None)
def _buffered_one_supported() -> bool:
    """One-time check (NOT in the hot path) that pl.Buffered(1) on a
    constant-index resident block compiles and runs correctly."""
    def k(x_ref, o_ref):
        o_ref[...] = x_ref[...]

    try:
        fn = pl.pallas_call(
            k,
            out_shape=jax.ShapeDtypeStruct((8, 128), jnp.float32),
            grid=(1,),
            in_specs=[pl.BlockSpec((8, 128), lambda i: (0, 0),
                                   pipeline_mode=pl.Buffered(1))],
            out_specs=pl.BlockSpec((8, 128), lambda i: (0, 0)),
        )
        x = jnp.arange(8 * 128, dtype=jnp.float32).reshape(8, 128)
        return bool(jnp.array_equal(jax.block_until_ready(fn(x)), x))
    except Exception:
        return False


# --------------------------------------------------------------------------
# Kernels
# --------------------------------------------------------------------------

def residual_block_kernel(x_ref, w1_ref, b1_ref, w2_ref, b2_ref, o_ref):
    """Fused relu(fc2(relu(fc1(x))) + x) on one (tb, Dp) batch tile.

    Both full (Dp, Dp) weights are VMEM-resident; x / out are streamed over
    the batch grid axis.
    """
    x = x_ref[...]
    # fc1 + ReLU (f32 accumulation on the MXU).
    h = jnp.dot(x, w1_ref[...], preferred_element_type=jnp.float32) + b1_ref[...]
    h = jnp.maximum(h, 0.0)
    # Second matmul operands in the parameter dtype (bf16 params -> fast bf16
    # MXU path); accumulator stays f32.
    h = h.astype(w2_ref.dtype)
    y = jnp.dot(h, w2_ref[...], preferred_element_type=jnp.float32) + b2_ref[...]
    # Residual add + final ReLU; lane-dense full-width store.
    o_ref[...] = jnp.maximum(y + x.astype(jnp.float32), 0.0).astype(o_ref.dtype)


def residual_block_tiled_kernel(x_ref, w1_ref, b1_ref, w2_ref, b2_ref,
                                o_ref, acc_ref):
    """Hidden-tiled variant for large D (weights do not fit VMEM-resident).

    Grid = (batch_tiles, hidden_tiles); hidden axis is a reduction for the
    second matmul with an f32 VMEM accumulator (init/finalize via pl.when).
    h_j = relu(x @ W1[:, j] + b1[j]);  acc += h_j @ W2[j, :].
    """
    j = pl.program_id(1)

    @pl.when(j == 0)
    def _():
        acc_ref[...] = jnp.zeros_like(acc_ref)

    x = x_ref[...]
    h = jnp.dot(x, w1_ref[...], preferred_element_type=jnp.float32) + b1_ref[...]
    h = jnp.maximum(h, 0.0).astype(w2_ref.dtype)
    acc_ref[...] += jnp.dot(h, w2_ref[...], preferred_element_type=jnp.float32)

    @pl.when(j == pl.num_programs(1) - 1)
    def _():
        y = acc_ref[...] + b2_ref[...]
        o_ref[...] = jnp.maximum(y + x.astype(jnp.float32), 0.0).astype(o_ref.dtype)


# --------------------------------------------------------------------------
# Parameter prep (one-time, hoisted out of the per-call path)
# --------------------------------------------------------------------------

def prepare_params(w1, b1, w2, b2, *, weight_dtype=None):
    """Takes PyTorch-layout params (w: (out, in), b: (out,)) and returns
    (w1_t, b1_2d, w2_t, b2_2d): transposed to (in, out), zero-padded so the
    feature dim is a lane-dense multiple of 128, and optionally cast to a
    narrower MXU dtype (e.g. jnp.bfloat16) for full MXU rate / halved VMEM."""
    d = w1.shape[0]
    dp = max(_round_up(d, _LANE), _LANE)

    def prep_w(w):
        wt = jnp.asarray(w).T  # (in, out)
        if weight_dtype is not None:
            wt = wt.astype(weight_dtype)
        return jnp.pad(wt, ((0, dp - d), (0, dp - d)))

    def prep_b(b):
        b2d = jnp.asarray(b).reshape(1, d)
        return jnp.pad(b2d, ((0, 0), (0, dp - d)))

    return prep_w(w1), prep_b(b1), prep_w(w2), prep_b(b2)


# --------------------------------------------------------------------------
# pallas_call wrappers
# --------------------------------------------------------------------------

def _choose_batch_tile(b, dp, isx, isw, pack, weight_bytes, budget, num_tc):
    # Cap by feature size: small D is HBM/overhead bound -> big batch tiles.
    if dp <= 512:
        cap_d = 2048
    elif dp <= 1024:
        cap_d = 1024
    else:
        cap_d = 512
    # Cap by VMEM: x/out double-buffered + fused intermediates per row.
    per_row = dp * (4 * isx + 12 + isw)
    avail = max(budget - weight_bytes - (4 << 20), per_row * pack)
    cap_vmem = max(pack, (avail // per_row) // pack * pack)

    tb = min(_round_up(b, pack), cap_d, cap_vmem)
    tb = max(tb, pack)

    # Only split for parallelism on multi-TC chips (v7x): target >= 4 steps
    # per core so each core keeps DMA/compute overlap after the megacore split.
    if num_tc >= 2:
        target = 4 * num_tc
        if pl.cdiv(b, tb) < target and b >= target * pack:
            tb = max(pack, _round_up(pl.cdiv(b, target), pack))
    return tb


def _choose_hidden_tile(dp):
    for th in (512, 256, 128):
        if dp % th == 0 and dp // th >= 2:
            return th
    return dp  # dp == 128: single hidden step


def _forward_resident(xp, w1_t, b1, w2_t, b2, *, tb, single_buffer_weights,
                      vmem_limit):
    bsz, dp = xp.shape
    grid = (pl.cdiv(bsz, tb),)

    # Constant-index resident blocks: one VMEM copy instead of double buffer.
    wkw = dict(pipeline_mode=pl.Buffered(1)) if single_buffer_weights else {}

    in_specs = [
        pl.BlockSpec((tb, dp), lambda i: (i, 0)),               # x (streamed)
        pl.BlockSpec((dp, dp), lambda i: (0, 0), **wkw),        # w1 (resident)
        pl.BlockSpec((1, dp), lambda i: (0, 0), **wkw),         # b1
        pl.BlockSpec((dp, dp), lambda i: (0, 0), **wkw),        # w2 (resident)
        pl.BlockSpec((1, dp), lambda i: (0, 0), **wkw),         # b2
    ]
    out_specs = pl.BlockSpec((tb, dp), lambda i: (i, 0))

    isx = jnp.dtype(xp.dtype).itemsize
    isw = jnp.dtype(w1_t.dtype).itemsize
    flops = 4 * bsz * dp * dp
    bytes_accessed = 2 * bsz * dp * isx + 2 * dp * dp * isw + 2 * dp * 4

    return pl.pallas_call(
        residual_block_kernel,
        out_shape=jax.ShapeDtypeStruct((bsz, dp), xp.dtype),
        grid=grid,
        in_specs=in_specs,
        out_specs=out_specs,
        compiler_params=pltpu.CompilerParams(
            dimension_semantics=("parallel",),
            vmem_limit_bytes=vmem_limit,
        ),
        cost_estimate=pl.CostEstimate(
            flops=flops, transcendentals=0, bytes_accessed=bytes_accessed),
    )(xp, w1_t, b1, w2_t, b2)


def _forward_hidden_tiled(xp, w1_t, b1, w2_t, b2, *, tb, th, vmem_limit):
    bsz, dp = xp.shape
    grid = (pl.cdiv(bsz, tb), dp // th)   # hidden (reduction) axis last

    in_specs = [
        pl.BlockSpec((tb, dp), lambda i, j: (i, 0)),   # x tile
        pl.BlockSpec((dp, th), lambda i, j: (0, j)),   # w1 column block
        pl.BlockSpec((1, th), lambda i, j: (0, j)),    # b1 block
        pl.BlockSpec((th, dp), lambda i, j: (j, 0)),   # w2 row block
        pl.BlockSpec((1, dp), lambda i, j: (0, 0)),    # b2
    ]
    out_specs = pl.BlockSpec((tb, dp), lambda i, j: (i, 0))

    isx = jnp.dtype(xp.dtype).itemsize
    isw = jnp.dtype(w1_t.dtype).itemsize
    n_btiles = pl.cdiv(bsz, tb)
    flops = 4 * bsz * dp * dp
    bytes_accessed = (2 * bsz * dp * isx + 2 * dp * dp * isw * n_btiles
                      + 2 * dp * 4)

    return pl.pallas_call(
        residual_block_tiled_kernel,
        out_shape=jax.ShapeDtypeStruct((bsz, dp), xp.dtype),
        grid=grid,
        in_specs=in_specs,
        out_specs=out_specs,
        scratch_shapes=[pltpu.VMEM((tb, dp), jnp.float32)],
        compiler_params=pltpu.CompilerParams(
            dimension_semantics=("parallel", "arbitrary"),
            vmem_limit_bytes=vmem_limit,
        ),
        cost_estimate=pl.CostEstimate(
            flops=flops, transcendentals=0, bytes_accessed=bytes_accessed),
    )(xp, w1_t, b1, w2_t, b2)


def residual_block_apply(x, prepared_params, *, batch_tile=None,
                         force_tiled=False, stream_dtype=None):
    """x: (B, D); prepared_params: output of prepare_params(). Pure & jittable
    (no host syncs, no exception handling in the hot path)."""
    w1_t, b1, w2_t, b2 = prepared_params
    b, d = x.shape
    dp = w1_t.shape[0]

    # Optional narrower activation streaming (accumulators stay f32 in-kernel).
    xp = x.astype(stream_dtype) if (stream_dtype is not None
                                    and jnp.dtype(stream_dtype) != x.dtype) else x
    # Only the feature (lane) dim needs padding, and only when D % 128 != 0.
    # Ragged batch tails are handled in-kernel via pl.cdiv grid + masked blocks.
    if d != dp:
        xp = jnp.pad(xp, ((0, 0), (0, dp - d)))

    pack = _sublane_pack(xp.dtype)
    isx = jnp.dtype(xp.dtype).itemsize
    isw = jnp.dtype(w1_t.dtype).itemsize

    vmem_cap, num_tc = _tpu_config()
    budget = _vmem_budget(vmem_cap)

    single_buf = _buffered_one_supported()
    w_copies = 1 if single_buf else 2
    resident_w_bytes = (2 * dp * dp * isw + 2 * dp * 4) * w_copies

    use_tiled = force_tiled or (resident_w_bytes > budget // 2)

    if use_tiled:
        th = _choose_hidden_tile(dp)
        stream_w_bytes = 4 * dp * th * isw + 4 * th * 4 + 2 * dp * 4
        if batch_tile is None:
            tb = _choose_batch_tile(b, dp, isx, isw, pack, stream_w_bytes,
                                    budget, num_tc)
        else:
            tb = max(pack, _round_up(batch_tile, pack))
        vmem_needed = (stream_w_bytes
                       + 4 * tb * dp * isx              # x + out, double-buffered
                       + tb * dp * 4                    # f32 accumulator scratch
                       + tb * th * (4 + isw)            # h (f32 + cast copy)
                       + tb * dp * 8)                   # partial product + residual
        vmem_limit = max(16 << 20,
                         min(int(vmem_needed * 1.25) + (4 << 20), budget))
        out_p = _forward_hidden_tiled(xp, w1_t, b1, w2_t, b2,
                                      tb=tb, th=th, vmem_limit=vmem_limit)
    else:
        if batch_tile is None:
            tb = _choose_batch_tile(b, dp, isx, isw, pack, resident_w_bytes,
                                    budget, num_tc)
        else:
            tb = max(pack, _round_up(batch_tile, pack))
        vmem_needed = (resident_w_bytes
                       + 4 * tb * dp * isx              # x + out, double-buffered
                       + tb * dp * (12 + isw))          # h f32, h cast, y f32, x f32
        vmem_limit = max(16 << 20,
                         min(int(vmem_needed * 1.25) + (4 << 20), budget))
        out_p = _forward_resident(xp, w1_t, b1, w2_t, b2, tb=tb,
                                  single_buffer_weights=single_buf,
                                  vmem_limit=vmem_limit)

    out_p = out_p[:, :d] if d != dp else out_p
    if out_p.dtype != x.dtype:
        out_p = out_p.astype(x.dtype)
    return out_p


def residual_block(x, w1, b1, w2, b2, **kwargs):
    """Convenience wrapper taking PyTorch-layout params. In real use, call
    prepare_params() once and reuse the prepared params."""
    return residual_block_apply(x, prepare_params(w1, b1, w2, b2), **kwargs)


def _reference(x, w1, b1, w2, b2):
    h = jnp.maximum(x @ w1.T + b1, 0.0)
    y = h @ w2.T + b2
    return jnp.maximum(y + x, 0.0)


if __name__ == "__main__":
    dim, batch = 32, 8

    key = jax.random.PRNGKey(0)
    keys = jax.random.split(key, 10)

    bound = 1.0 / float(dim) ** 0.5
    x = jax.random.normal(keys[0], (batch, dim), dtype=jnp.float32)
    w1 = jax.random.uniform(keys[1], (dim, dim), jnp.float32, -bound, bound)
    b1 = jax.random.uniform(keys[2], (dim,), jnp.float32, -bound, bound)
    w2 = jax.random.uniform(keys[3], (dim, dim), jnp.float32, -bound, bound)
    b2 = jax.random.uniform(keys[4], (dim,), jnp.float32, -bound, bound)

    # One-time parameter prep (transpose + lane-dense padding).
    params = prepare_params(w1, b1, w2, b2)
    ref = _reference(x, w1, b1, w2, b2)

    # Hot path is pure and jittable (no host sync / try-except inside).
    fwd = jax.jit(residual_block_apply)
    out = jax.block_until_ready(fwd(x, params))
    assert out.shape == (batch, dim)
    assert jnp.allclose(out, ref, atol=1e-5, rtol=1e-5), "f32 mismatch vs reference"

    # bf16 params + activations (fast bf16 MXU path, f32 accumulation),
    # validated against the f32 reference at bf16-appropriate tolerances.
    params_bf16 = prepare_params(w1, b1, w2, b2, weight_dtype=jnp.bfloat16)
    out_bf16 = jax.block_until_ready(fwd(x.astype(jnp.bfloat16), params_bf16))
    assert out_bf16.shape == (batch, dim)
    assert jnp.allclose(out_bf16.astype(jnp.float32), ref, atol=5e-2, rtol=5e-2), \
        "bf16 mismatch vs f32 reference"

    # Exercise the hidden-tiled (large-D / v7x) path on a modest shape.
    dim2, batch2 = 256, 64
    bound2 = 1.0 / float(dim2) ** 0.5
    x2 = jax.random.normal(keys[5], (batch2, dim2), dtype=jnp.float32)
    w3 = jax.random.uniform(keys[6], (dim2, dim2), jnp.float32, -bound2, bound2)
    b3 = jax.random.uniform(keys[7], (dim2,), jnp.float32, -bound2, bound2)
    w4 = jax.random.uniform(keys[8], (dim2, dim2), jnp.float32, -bound2, bound2)
    b4 = jax.random.uniform(keys[9], (dim2,), jnp.float32, -bound2, bound2)
    params2 = prepare_params(w3, b3, w4, b4)
    ref2 = _reference(x2, w3, b3, w4, b4)

    fwd_tiled = jax.jit(functools.partial(residual_block_apply, force_tiled=True))
    out2 = jax.block_until_ready(fwd_tiled(x2, params2))
    assert out2.shape == (batch2, dim2)
    assert jnp.allclose(out2, ref2, atol=5e-4, rtol=5e-4), \
        "tiled-path mismatch vs reference"

    print("KERNEL_OK")
</pallas_src>

<mosaic_0001>
module attributes {stable_mosaic.version = 11 : i64} {
  func.func @residual_block_kernel(%arg0: i32, %arg1: memref<8x128xf32, #tpu.memory_space<vmem>>, %arg2: memref<128x128xf32, #tpu.memory_space<vmem>>, %arg3: memref<1x128xf32, #tpu.memory_space<vmem>>, %arg4: memref<128x128xf32, #tpu.memory_space<vmem>>, %arg5: memref<1x128xf32, #tpu.memory_space<vmem>>, %arg6: memref<8x128xf32, #tpu.memory_space<vmem>>) attributes {dimension_semantics = [#tpu.dimension_semantics<parallel>], iteration_bounds = array<i64: 1>, scalar_prefetch = 0 : i64, scratch_operands = 0 : i64, tpu.core_type = #tpu.core_type<tc>, window_params = [{transform_indices = @transform_0, window_bounds = array<i64: 8, 128>}, {pipeline_mode = #tpu.pipeline_mode<synchronous>, transform_indices = @transform_1, window_bounds = array<i64: 128, 128>}, {pipeline_mode = #tpu.pipeline_mode<synchronous>, transform_indices = @transform_2, window_bounds = array<i64: 1, 128>}, {pipeline_mode = #tpu.pipeline_mode<synchronous>, transform_indices = @transform_3, window_bounds = array<i64: 128, 128>}, {pipeline_mode = #tpu.pipeline_mode<synchronous>, transform_indices = @transform_4, window_bounds = array<i64: 1, 128>}, {transform_indices = @transform_5, window_bounds = array<i64: 8, 128>}]} {
    %c0 = arith.constant 0 : index
    %c0_0 = arith.constant 0 : index
    %0 = vector.load %arg1[%c0, %c0_0] : memref<8x128xf32, #tpu.memory_space<vmem>>, vector<8x128xf32>
    %c0_1 = arith.constant 0 : index
    %c0_2 = arith.constant 0 : index
    %1 = vector.load %arg2[%c0_1, %c0_2] : memref<128x128xf32, #tpu.memory_space<vmem>>, vector<128x128xf32>
    %cst = arith.constant dense<0.000000e+00> : vector<8x128xf32>
    %2 = tpu.matmul %0, %1, %cst {dimension_numbers = #tpu.dot_dimension_numbers<[1], [0], [0], [1], [0, 0, 1, 1], [], []>} : vector<8x128xf32>, vector<128x128xf32>, vector<8x128xf32> -> vector<8x128xf32>
    %c0_3 = arith.constant 0 : index
    %c0_4 = arith.constant 0 : index
    %3 = vector.load %arg3[%c0_3, %c0_4] : memref<1x128xf32, #tpu.memory_space<vmem>>, vector<1x128xf32>
    %4 = vector.broadcast %3 : vector<1x128xf32> to vector<8x128xf32>
    %5 = arith.addf %2, %4 : vector<8x128xf32>
    %cst_5 = arith.constant 0.000000e+00 : f32
    %6 = vector.broadcast %cst_5 : f32 to vector<8x128xf32>
    %7 = arith.maximumf %5, %6 : vector<8x128xf32>
    %c0_6 = arith.constant 0 : index
    %c0_7 = arith.constant 0 : index
    %8 = vector.load %arg4[%c0_6, %c0_7] : memref<128x128xf32, #tpu.memory_space<vmem>>, vector<128x128xf32>
    %cst_8 = arith.constant dense<0.000000e+00> : vector<8x128xf32>
    %9 = tpu.matmul %7, %8, %cst_8 {dimension_numbers = #tpu.dot_dimension_numbers<[1], [0], [0], [1], [0, 0, 1, 1], [], []>} : vector<8x128xf32>, vector<128x128xf32>, vector<8x128xf32> -> vector<8x128xf32>
    %c0_9 = arith.constant 0 : index
    %c0_10 = arith.constant 0 : index
    %10 = vector.load %arg5[%c0_9, %c0_10] : memref<1x128xf32, #tpu.memory_space<vmem>>, vector<1x128xf32>
    %11 = vector.broadcast %10 : vector<1x128xf32> to vector<8x128xf32>
    %12 = arith.addf %9, %11 : vector<8x128xf32>
    %13 = arith.addf %12, %0 : vector<8x128xf32>
    %cst_11 = arith.constant 0.000000e+00 : f32
    %14 = vector.broadcast %cst_11 : f32 to vector<8x128xf32>
    %15 = arith.maximumf %13, %14 : vector<8x128xf32>
    %c0_12 = arith.constant 0 : index
    %c0_13 = arith.constant 0 : index
    %16 = vector.load %arg6[%c0_12, %c0_13] : memref<8x128xf32, #tpu.memory_space<vmem>>, vector<8x128xf32>
    tpu.vector_store %arg6[%c0_12, %c0_13], %15 {strides = array<i32>} : memref<8x128xf32, #tpu.memory_space<vmem>>, vector<8x128xf32>,
    return
  }
  func.func @transform_0(%arg0: i32) -> (i32, i32) {
    %c0_i32 = arith.constant 0 : i32
    %c0_i32_0 = arith.constant 0 : i32
    return %arg0, %c0_i32 : i32, i32
  }
  func.func @transform_1(%arg0: i32) -> (i32, i32) {
    %c0_i32 = arith.constant 0 : i32
    %c0_i32_0 = arith.constant 0 : i32
    %c0_i32_1 = arith.constant 0 : i32
    return %c0_i32, %c0_i32_0 : i32, i32
  }
  func.func @transform_2(%arg0: i32) -> (i32, i32) {
    %c0_i32 = arith.constant 0 : i32
    %c0_i32_0 = arith.constant 0 : i32
    %c0_i32_1 = arith.constant 0 : i32
    return %c0_i32, %c0_i32_0 : i32, i32
  }
  func.func @transform_3(%arg0: i32) -> (i32, i32) {
    %c0_i32 = arith.constant 0 : i32
    %c0_i32_0 = arith.constant 0 : i32
    %c0_i32_1 = arith.constant 0 : i32
    return %c0_i32, %c0_i32_0 : i32, i32
  }
  func.func @transform_4(%arg0: i32) -> (i32, i32) {
    %c0_i32 = arith.constant 0 : i32
    %c0_i32_0 = arith.constant 0 : i32
    %c0_i32_1 = arith.constant 0 : i32
    return %c0_i32, %c0_i32_0 : i32, i32
  }
  func.func @transform_5(%arg0: i32) -> (i32, i32) {
    %c0_i32 = arith.constant 0 : i32
    %c0_i32_0 = arith.constant 0 : i32
    return %arg0, %c0_i32 : i32, i32
  }
}

</mosaic_0001>

<bundles_post_ra>
// kernel: residual_block_apply.1
= control target key start
LH: loop header
LB: loop body
LE: loop exit
PB: predicated region body
PF: predicated region fallthrough
CT: control target
= control target key end

     0   :  { %10 = vsyncpa [#allocation3], 0  ;;  %s294_s0 = inlined_call_operand.vmem [shape: f32[8,128], index: 0, kind: input, shape index: {}]   ;;  %s295_s1 = inlined_call_operand.hbm [shape: f32[128,128], index: 1, kind: input, shape index: {}]   ;;  %s296_s2 = inlined_call_operand.vmem [shape: f32[1,128], index: 2, kind: input, shape index: {}]   ;;  %s297_s3 = inlined_call_operand.hbm [shape: f32[128,128], index: 3, kind: input, shape index: {}]   ;;  %s298_s4 = inlined_call_operand.vmem [shape: f32[1,128], index: 4, kind: input, shape index: {}]   ;;  %s299_s5 = inlined_call_operand.hbm [shape: f32[8,128], index: 5, kind: output, shape index: {}]  }
   0x1   :  { %11 = vsyncpa [#allocation6], 0 }
   0x2   :  { %12 = vsyncpa [#allocation4], 0  ;;  %s19_s20 = sshll.u32 %s295_s1, 4  ;;  %s241_s21 = smov [#allocation2]   ;;  %s20_s20 = int_to_ptr.hbm [resolvable:$true] %s19_s20 }
   0x3   :  { %s21_s22 = sshll.u32 %s241_s21, 4  ;;  %s34_s25 = sshll.u32 %s297_s3, 4  ;;  %s22_s22 = int_to_ptr.vmem [resolvable:$true] %s21_s22  ;;  %s35_s25 = int_to_ptr.hbm [resolvable:$true] %s34_s25 }
   0x4   :  { %s242_s26 = smov 128   ;;  %s243_s27 = smov 8  }
   0x5   :  { %27 = dma.hbm_to_vmem [thread:$0]  %s20_s20, 2048, %s22_s22, [#allocation3], %s242_s26, %s242_s26, %s243_s27  }
   0x6   :  { %s244_s28 = smov [#allocation5]  }
   0x7   :  { %s36_s29 = sshll.u32 %s244_s28, 4  ;;  %s37_s29 = int_to_ptr.vmem [resolvable:$true] %s36_s29 }
   0x8   :  { %42 = dma.hbm_to_vmem [thread:$0]  %s35_s25, 2048, %s37_s29, [#allocation6], %s242_s26, %s242_s26, %s243_s27  }
   0x9   :  { %235 = dma.done.wait [#allocation3], 2048  }
   0xa   :  { %236 = vsyncadd [#allocation3], 4294965248 }
   0xb   :  { %237 = dma.done.wait [#allocation6], 2048  }
   0xc   :  { %238 = vsyncadd [#allocation6], 4294965248  ;;  %v69_v0 = vld [vmem:[#allocation2 + $0x78] sm:$0xff]  ;;  %v68_v1 = vld [vmem:[#allocation2 + $0x70] sm:$0xff]  ;;  %s145_s12 = sshll.u32 %s299_s5, 4  ;;  %s146_s12 = int_to_ptr.hbm [resolvable:$true] %s145_s12 }
   0xd   :  { %74 = vmatpush.msra.mxu0 %v69_v0  ;;  %v67_v2 = vld [vmem:[#allocation2 + $0x68] sm:$0xff]  ;;  %v66_v3 = vld [vmem:[#allocation2 + $0x60] sm:$0xff]  ;;  %v110_v4 = vld [vmem:[#allocation5 + $0x78] sm:$0xff] }
   0xe   :  { %v65_v5 = vld [vmem:[#allocation2 + $0x58] sm:$0xff]  ;;  %115 = vmatpush.msra.mxu1 %v110_v4  ;;  %v109_v6 = vld [vmem:[#allocation5 + $0x70] sm:$0xff]  ;;  %v108_v7 = vld [vmem:[#allocation5 + $0x68] sm:$0xff] }
   0xf   :  { %75 = vmatpush.msra.mxu0 %v68_v1  ;;  %v64_v8 = vld [vmem:[#allocation2 + $0x50] sm:$0xff]  ;;  %v107_v9 = vld [vmem:[#allocation5 + $0x60] sm:$0xff]  ;;  %v63_v10 = vld [vmem:[#allocation2 + $0x48] sm:$0xff] }
  0x10   :  { %116 = vmatpush.msra.mxu1 %v109_v6  ;;  %v106_v11 = vld [vmem:[#allocation5 + $0x58] sm:$0xff]  ;;  %v62_v12 = vld [vmem:[#allocation2 + $0x40] sm:$0xff]  ;;  %v105_v13 = vld [vmem:[#allocation5 + $0x50] sm:$0xff] }
  0x11   :  { %76 = vmatpush.msra.mxu0 %v67_v2  ;;  %v61_v14 = vld [vmem:[#allocation2 + $0x38] sm:$0xff]  ;;  %v104_v15 = vld [vmem:[#allocation5 + $0x48] sm:$0xff]  ;;  %v60_v16 = vld [vmem:[#allocation2 + $0x30] sm:$0xff] }
  0x12   :  { %117 = vmatpush.msra.mxu1 %v108_v7  ;;  %v103_v17 = vld [vmem:[#allocation5 + $0x40] sm:$0xff]  ;;  %v59_v18 = vld [vmem:[#allocation2 + $0x28] sm:$0xff]  ;;  %v102_v19 = vld [vmem:[#allocation5 + $0x38] sm:$0xff] }
  0x13   :  { %77 = vmatpush.msra.mxu0 %v66_v3  ;;  %v58_v20 = vld [vmem:[#allocation2 + $0x20] sm:$0xff]  ;;  %v101_v21 = vld [vmem:[#allocation5 + $0x30] sm:$0xff]  ;;  %v57_v22 = vld [vmem:[#allocation2 + $0x18] sm:$0xff] }
  0x14   :  { %118 = vmatpush.msra.mxu1 %v107_v9  ;;  %v100_v23 = vld [vmem:[#allocation5 + $0x28] sm:$0xff]  ;;  %v56_v24 = vld [vmem:[#allocation2 + $0x10] sm:$0xff]  ;;  %v99_v25 = vld [vmem:[#allocation5 + $0x20] sm:$0xff] }
  0x15   :  { %78 = vmatpush.msra.mxu0 %v65_v5  ;;  %v55_v26 = vld [vmem:[#allocation2 + $0x8] sm:$0xff]  ;;  %v98_v27 = vld [vmem:[#allocation5 + $0x18] sm:$0xff]  ;;  %v54_v28 = vld [vmem:[#allocation2] sm:$0xff] }
  0x16   :  { %119 = vmatpush.msra.mxu1 %v106_v11  ;;  %v53_v29 = vld [vmem:[%s294_s0] sm:$0xff]  ;;  %v97_v30 = vld [vmem:[#allocation5 + $0x10] sm:$0xff]  ;;  %v96_v31 = vld [vmem:[#allocation5 + $0x8] sm:$0xff]  ;;  %s245_s0 = smov [#allocation7]  }
  0x17   :  { %79 = vmatpush.msra.mxu0 %v64_v8  ;;  %v95_v32 = vld [vmem:[#allocation5] sm:$0xff]  ;;  %s143_s9 = sshll.u32 %s245_s0, 4  ;;  %s144_s9 = int_to_ptr.vmem [resolvable:$true] %s143_s9 }
  0x18   :  { %120 = vmatpush.msra.mxu1 %v105_v13  ;;  %v161_v33 = vld [vmem:[%s296_s2] ss:$0 sm:$0xff] }
  0x19   :  { %80 = vmatpush.msra.mxu0 %v63_v10  ;;  %v162_v37 = vld [vmem:[%s298_s4] ss:$0 sm:$0xff] }
  0x1a   :  { %121 = vmatpush.msra.mxu1 %v104_v15 }
  0x1b   :  { %81 = vmatpush.msra.mxu0 %v62_v12 }
  0x1c   :  { %122 = vmatpush.msra.mxu1 %v103_v17 }
  0x1d   :  { %82 = vmatpush.msra.mxu0 %v61_v14 }
  0x1e   :  { %123 = vmatpush.msra.mxu1 %v102_v19 }
  0x1f   :  { %83 = vmatpush.msra.mxu0 %v60_v16 }
  0x20   :  { %124 = vmatpush.msra.mxu1 %v101_v21 }
  0x21   :  { %84 = vmatpush.msra.mxu0 %v59_v18 }
  0x22   :  { %125 = vmatpush.msra.mxu1 %v100_v23 }
  0x23   :  { %85 = vmatpush.msra.mxu0 %v58_v20 }
  0x24   :  { %126 = vmatpush.msra.mxu1 %v99_v25 }
  0x25   :  { %86 = vmatpush.msra.mxu0 %v57_v22 }
  0x26   :  { %127 = vmatpush.msra.mxu1 %v98_v27 }
  0x27   :  { %87 = vmatpush.msra.mxu0 %v56_v24 }
  0x28   :  { %128 = vmatpush.msra.mxu1 %v97_v30 }
  0x29   :  { %88 = vmatpush.msra.mxu0 %v55_v26 }
  0x2a   :  { %129 = vmatpush.msra.mxu1 %v96_v31 }
  0x2b   :  { %89 = vmatpush.msra.mxu0 %v54_v28 }
  0x2c   :  { %90 = vmatmul.f32.vlgmr.msra.gmra.mxu0 %v53_v29  ;;  %130 = vmatpush.msra.mxu1 %v95_v32 }
  0xa9   :  { %v91_v34 = vpop.f32.mrf.mxu0 }
  0xaa   :  { %v92_v35 = vadd.f32 %v161_v33, %v91_v34 }
  0xac   :  { %v94_v36 = vmax.f32 %v92_v35, 0.0 }
  0xae   :  { %131 = vmatmul.f32.vlgmr.msra.gmra.mxu1 %v94_v36 }
 0x12b   :  { %v132_v38 = vpop.f32.mrf.mxu1 }
 0x12c   :  { %v133_v39 = vadd.f32 %v162_v37, %v132_v38 }
 0x12e   :  { %v135_v40 = vadd.f32 %v133_v39, %v53_v29 }
 0x130   :  { %v136_v41 = vmax.f32 %v135_v40, 0.0 }
 0x132   :  { %137 = vst [vmem:[#allocation7] sm:$0xff] %v136_v41 }
 0x133   :  { %148 = dma.vmem_to_hbm [thread:$0]  %s144_s9, 128, %s146_s12, [#allocation4]  }
 0x134   :  { %239 = dma.done.wait [#allocation4], 128  }
 0x135   :  { %240 = vsyncadd [#allocation4], 4294967168 }
 0x136   :  { %153 = vsyncpa [#allocation3], 1 }
 0x137   :  { %154 = vsyncpa [#allocation6], 1 }
 0x138   :  { %155 = vsyncpa [#allocation4], 1 }

</bundles_post_ra>
